<compile_context>
chip_gen: v6e
topology: v6e:2x2x1
jax: 0.10.0
libtpu: 0.0.40
codegen_flags: <defaults>
</compile_context>

<pallas_src>
import jax
import jax.numpy as jnp
from jax.experimental import pallas as pl
from jax.experimental.pallas import tpu as pltpu


def _round_up(a, m):
    return ((a + m - 1) // m) * m


def final_layer_kernel(scale1_ref, x_ref, w_ref, bias_ref, o_ref):
    # scale1_ref: (B, H) resident, x dtype; x_ref: (TILE_T, H);
    # w_ref: (H, O_pad) resident; bias_ref: (B, O_pad) f32 resident;
    # o_ref: (TILE_T, O_pad).
    b = pl.program_id(0)

    scale1 = scale1_ref[pl.ds(b, 1), :]            # (1, H) row of this batch element
    xm = x_ref[...] * scale1                       # modulate (shift folded into bias)

    # NOTE: for a partial last token tile the out-of-range rows hold garbage; every op
    # below is row-independent and the masked writeback discards those rows, so this is
    # safe.  (A future row-reduction here would break that assumption.)
    y = jnp.dot(xm, w_ref[...], preferred_element_type=jnp.float32)
    y = y + bias_ref[pl.ds(b, 1), :]               # f32 bias (shift @ W + b) for batch b
    o_ref[...] = y.astype(o_ref.dtype)


def final_layer_dim(x, c, w_ada, b_ada, w_lin, b_lin, *, tile_t=1024,
                    return_padded=False):
    """x: (B, T, H), c: (B, H), w_ada: (H, 2H), b_ada: (1, 2H),
       w_lin: (H, O), b_lin: (1, O) -> (B, T, O) (or (B, T, O_pad) if return_padded)."""
    B, T, H = x.shape
    O = w_lin.shape[1]
    x_dtype = x.dtype
    itemsize = jnp.dtype(x_dtype).itemsize

    # ---- adaLN branch hoisted out of the kernel (tiny matmul; keeps W_ada out of VMEM).
    c32 = c.astype(jnp.float32)
    silu_c = c32 * jax.nn.sigmoid(c32)
    mod = silu_c @ w_ada.astype(jnp.float32) + b_ada.astype(jnp.float32)   # (B, 2H)
    shift = mod[:, :H]                                                     # (B, H) f32
    scale = mod[:, H:]                                                     # (B, H) f32

    # ---- Lane-dense output: pad O up to a multiple of 128 (don't over-pad past 128
    #      to "fill" the wide MXU - the kernel is HBM-bound, extra columns only cost
    #      write bandwidth).
    O_pad = _round_up(O, 128)
    if O_pad != O:
        w_lin_p = jnp.pad(w_lin, ((0, 0), (0, O_pad - O)))
        b_lin_p = jnp.pad(b_lin, ((0, 0), (0, O_pad - O)))
    else:
        w_lin_p, b_lin_p = w_lin, b_lin
    # Matmul operands in x's dtype (MXU-native for bf16 inputs); f32 accumulation in-kernel.
    w_lin_p = w_lin_p.astype(x_dtype)

    # ---- Fold shift into the bias: bias_b = shift @ W + b  (tiny (B, O_pad) matmul).
    bias_b = shift @ w_lin_p.astype(jnp.float32) + b_lin_p.astype(jnp.float32)  # (B, O_pad) f32
    scale1 = (1.0 + scale).astype(x_dtype)                                       # (B, H)

    # ---- Token tiling.
    TILE_T = min(tile_t, T)
    if TILE_T < T:
        TILE_T = max(8, (TILE_T // 8) * 8)          # non-full blocks must be 8-divisible

    # Cap by a VMEM budget (double-buffered x tile + out tile dominate); keeps the big
    # tile legal under every generation's scoped-VMEM limit (explicitly raised to 32 MiB
    # below - safe: v5e/v6e physical is 128 MiB, v7x is 64 MiB).
    vmem_budget = 20 * 1024 * 1024
    per_row_bytes = 2 * (H + O_pad) * itemsize
    max_rows = max(8, (vmem_budget // per_row_bytes) // 8 * 8)
    if max_rows < TILE_T:
        TILE_T = max_rows

    # v7x megacore: make sure there are >= 2 parallel grid steps so both TCs get work.
    if B * pl.cdiv(T, TILE_T) < 2 and T >= 16:
        TILE_T = max(8, _round_up(pl.cdiv(T, 2), 8))

    grid = (B, pl.cdiv(T, TILE_T))

    cost = pl.CostEstimate(
        flops=2 * B * T * H * O_pad,
        transcendentals=0,
        bytes_accessed=(B * T * H * itemsize                          # read x
                        + B * T * O_pad * itemsize                    # write out
                        + H * O_pad * itemsize                        # w_lin (once)
                        + B * H * itemsize + B * O_pad * 4),          # scale1 / bias_b
    )

    grid_spec = pltpu.PrefetchScalarGridSpec(
        num_scalar_prefetch=0,
        grid=grid,
        in_specs=[
            # Full (B, H) block, constant index_map -> DMA'd once, resident in VMEM.
            pl.BlockSpec((B, H), lambda b, t: (0, 0)),                 # scale1
            pl.BlockSpec((None, TILE_T, H), lambda b, t: (b, t, 0)),   # x token tile
            pl.BlockSpec((H, O_pad), lambda b, t: (0, 0)),             # w_lin (resident)
            pl.BlockSpec((B, O_pad), lambda b, t: (0, 0)),             # bias_b (resident)
        ],
        out_specs=pl.BlockSpec((None, TILE_T, O_pad), lambda b, t: (b, t, 0)),
    )

    out_padded = pl.pallas_call(
        final_layer_kernel,
        out_shape=jax.ShapeDtypeStruct((B, T, O_pad), x_dtype),
        grid_spec=grid_spec,
        compiler_params=pltpu.CompilerParams(
            dimension_semantics=("parallel", "parallel"),
            vmem_limit_bytes=32 * 1024 * 1024),
        cost_estimate=cost,
    )(scale1, x, w_lin_p, bias_b)

    if return_padded or O_pad == O:
        return out_padded
    # Production consumers (e.g. unpatchify) should take the padded slab directly so this
    # slice fuses away instead of costing an extra HBM pass.
    return out_padded[:, :, :O]


def _reference(x, c, w_ada, b_ada, w_lin, b_lin):
    silu_c = c * jax.nn.sigmoid(c)
    mod = silu_c @ w_ada + b_ada                            # (B, 2H)
    H = c.shape[-1]
    shift, scale = mod[:, :H], mod[:, H:]
    xm = x * (1 + scale[:, None, :]) + shift[:, None, :]
    return xm @ w_lin + b_lin


if __name__ == "__main__":
    # Small shapes consistent with the module.
    B, T = 2, 8
    hidden_size = 32
    patch_size = 2
    out_channels = 4
    O = patch_size * patch_size * out_channels              # 16

    key = jax.random.PRNGKey(0)
    kx, kc, k1, k2, k3, k4 = jax.random.split(key, 6)

    x = jax.random.normal(kx, (B, T, hidden_size), dtype=jnp.float32)
    c = jax.random.normal(kc, (B, hidden_size), dtype=jnp.float32)

    # PyTorch Linear weight is (out, in); we store pre-transposed (in, out).
    w_ada = (jax.random.normal(k1, (hidden_size, 2 * hidden_size), dtype=jnp.float32)
             * (1.0 / jnp.sqrt(hidden_size)))
    b_ada = (jax.random.normal(k2, (1, 2 * hidden_size), dtype=jnp.float32) * 0.01)
    w_lin = (jax.random.normal(k3, (hidden_size, O), dtype=jnp.float32)
             * (1.0 / jnp.sqrt(hidden_size)))
    b_lin = (jax.random.normal(k4, (1, O), dtype=jnp.float32) * 0.01)

    out = final_layer_dim(x, c, w_ada, b_ada, w_lin, b_lin)
    out = jax.block_until_ready(out)

    ref = _reference(x, c, w_ada, b_ada, w_lin, b_lin)
    assert out.shape == (B, T, O), out.shape
    assert jnp.allclose(out, ref, atol=1e-4, rtol=1e-4), float(jnp.max(jnp.abs(out - ref)))

    print("KERNEL_OK")
</pallas_src>

<mosaic_0001>
module attributes {stable_mosaic.version = 11 : i64} {
  func.func @final_layer_kernel(%arg0: i32, %arg1: i32, %arg2: memref<2x32xf32, #tpu.memory_space<vmem>>, %arg3: memref<1x8x32xf32, #tpu.memory_space<vmem>>, %arg4: memref<32x128xf32, #tpu.memory_space<vmem>>, %arg5: memref<2x128xf32, #tpu.memory_space<vmem>>, %arg6: memref<1x8x128xf32, #tpu.memory_space<vmem>>) attributes {dimension_semantics = [#tpu.dimension_semantics<parallel>, #tpu.dimension_semantics<parallel>], iteration_bounds = array<i64: 2, 1>, scalar_prefetch = 0 : i64, scratch_operands = 0 : i64, tpu.core_type = #tpu.core_type<tc>, window_params = [{pipeline_mode = #tpu.pipeline_mode<synchronous>, transform_indices = @transform_0, window_bounds = array<i64: 2, 32>}, {transform_indices = @transform_1, window_bounds = array<i64: 1, 8, 32>}, {pipeline_mode = #tpu.pipeline_mode<synchronous>, transform_indices = @transform_2, window_bounds = array<i64: 32, 128>}, {pipeline_mode = #tpu.pipeline_mode<synchronous>, transform_indices = @transform_3, window_bounds = array<i64: 2, 128>}, {transform_indices = @transform_4, window_bounds = array<i64: 1, 8, 128>}]} {
    %0 = arith.index_cast %arg0 : i32 to index
    %c0 = arith.constant 0 : index
    %1 = vector.load %arg2[%0, %c0] : memref<2x32xf32, #tpu.memory_space<vmem>>, vector<1x32xf32>
    %c0_0 = arith.constant 0 : index
    %c0_1 = arith.constant 0 : index
    %c0_2 = arith.constant 0 : index
    %2 = vector.load %arg3[%c0_0, %c0_1, %c0_2] : memref<1x8x32xf32, #tpu.memory_space<vmem>>, vector<1x8x32xf32>
    %3 = vector.shape_cast %2 : vector<1x8x32xf32> to vector<8x32xf32>
    %4 = vector.broadcast %1 : vector<1x32xf32> to vector<8x32xf32>
    %5 = arith.mulf %3, %4 : vector<8x32xf32>
    %c0_3 = arith.constant 0 : index
    %c0_4 = arith.constant 0 : index
    %6 = vector.load %arg4[%c0_3, %c0_4] : memref<32x128xf32, #tpu.memory_space<vmem>>, vector<32x128xf32>
    %cst = arith.constant dense<0.000000e+00> : vector<8x128xf32>
    %7 = tpu.matmul %5, %6, %cst {dimension_numbers = #tpu.dot_dimension_numbers<[1], [0], [0], [1], [0, 0, 1, 1], [], []>} : vector<8x32xf32>, vector<32x128xf32>, vector<8x128xf32> -> vector<8x128xf32>
    %8 = arith.index_cast %arg0 : i32 to index
    %c0_5 = arith.constant 0 : index
    %9 = vector.load %arg5[%8, %c0_5] : memref<2x128xf32, #tpu.memory_space<vmem>>, vector<1x128xf32>
    %10 = vector.broadcast %9 : vector<1x128xf32> to vector<8x128xf32>
    %11 = arith.addf %7, %10 : vector<8x128xf32>
    %c0_6 = arith.constant 0 : index
    %c0_7 = arith.constant 0 : index
    %c0_8 = arith.constant 0 : index
    %12 = vector.load %arg6[%c0_6, %c0_7, %c0_8] : memref<1x8x128xf32, #tpu.memory_space<vmem>>, vector<1x8x128xf32>
    %13 = vector.shape_cast %12 : vector<1x8x128xf32> to vector<8x128xf32>
    %14 = vector.shape_cast %11 : vector<8x128xf32> to vector<1x8x128xf32>
    tpu.vector_store %arg6[%c0_6, %c0_7, %c0_8], %14 {strides = array<i32>} : memref<1x8x128xf32, #tpu.memory_space<vmem>>, vector<1x8x128xf32>,
    return
  }
  func.func @transform_0(%arg0: i32, %arg1: i32) -> (i32, i32) {
    %c0_i32 = arith.constant 0 : i32
    %c0_i32_0 = arith.constant 0 : i32
    %c0_i32_1 = arith.constant 0 : i32
    return %c0_i32, %c0_i32_0 : i32, i32
  }
  func.func @transform_1(%arg0: i32, %arg1: i32) -> (i32, i32, i32) {
    %c0_i32 = arith.constant 0 : i32
    %c0_i32_0 = arith.constant 0 : i32
    return %arg0, %arg1, %c0_i32 : i32, i32, i32
  }
  func.func @transform_2(%arg0: i32, %arg1: i32) -> (i32, i32) {
    %c0_i32 = arith.constant 0 : i32
    %c0_i32_0 = arith.constant 0 : i32
    %c0_i32_1 = arith.constant 0 : i32
    return %c0_i32, %c0_i32_0 : i32, i32
  }
  func.func @transform_3(%arg0: i32, %arg1: i32) -> (i32, i32) {
    %c0_i32 = arith.constant 0 : i32
    %c0_i32_0 = arith.constant 0 : i32
    %c0_i32_1 = arith.constant 0 : i32
    return %c0_i32, %c0_i32_0 : i32, i32
  }
  func.func @transform_4(%arg0: i32, %arg1: i32) -> (i32, i32, i32) {
    %c0_i32 = arith.constant 0 : i32
    %c0_i32_0 = arith.constant 0 : i32
    return %arg0, %arg1, %c0_i32 : i32, i32, i32
  }
}

</mosaic_0001>

<bundles_post_ra>
// kernel: tpu_custom_call.1
= control target key start
LH: loop header
LB: loop body
LE: loop exit
PB: predicated region body
PF: predicated region fallthrough
CT: control target
= control target key end

     0   :  { %9 = vsyncpa [#allocation3], 0  ;;  %s982_s0 = inlined_call_operand.hbm [shape: f32[2,32], index: 0, kind: input, shape index: {}]   ;;  %s983_s1 = inlined_call_operand.hbm [shape: f32[2,8,32], index: 1, kind: input, shape index: {}]   ;;  %s984_s2 = inlined_call_operand.hbm [shape: f32[32,128], index: 2, kind: input, shape index: {}]   ;;  %s985_s3 = inlined_call_operand.vmem [shape: f32[2,128], index: 3, kind: input, shape index: {}]   ;;  %s986_s4 = inlined_call_operand.hbm [shape: f32[2,8,128], index: 4, kind: output, shape index: {}]  }
   0x1   :  { %10 = vsyncpa [#allocation6], 0 }
   0x2   :  { %12 = vsyncpa [#allocation6 + $0x1], 0 }
   0x3   :  { %13 = vsyncpa [#allocation4], 0 }
   0x4   :  { %15 = vsyncpa [#allocation4 + $0x1], 0  ;;  %s794_s15 = smov 0   ;;  %s796_s16 = smov 0  }
   0x5   :  { %s798_s17 = smov 0   ;;  %s800_s18 = smov 0  }
   0x6   :  { %s802_s19 = smov 0   ;;  %s804_s20 = smov 0  }
   0x7 LB: > { %s825_s21 = sadd.s32 4294967295, %s759_s20   ;;  %s469_s22 = sadd.s32 4294967294, %s759_s20   ;;  %s759_s20 = sphi %s804_s20, %s21_s20   ;;  %s755_s19 = sphi %s802_s19, %s1004_s19   ;;  %s751_s18 = sphi %s800_s18, %s1003_s18   ;;  %s747_s17 = sphi %s798_s17, %s1002_s17   ;;  %s743_s16 = sphi %s796_s16, %s1001_s16   ;;  %s739_s15 = sphi %s794_s15, %s1000_s15  }
   0x8   : > { %p76_p0 = scmp.ne.s32.totalorder %s743_s16, %s739_s15  ;;  %p987_p1 = scmp.eq.s32.totalorder %s825_s21, 0 }
   0x9   : > { %p150_p3 = scmp.eq.s32.totalorder %s469_s22, 1  ;;  %p470_p5 = scmp.ge.s32.totalorder %s759_s20, 1 }
   0xa   : > { %p834_p4 = por %p987_p1, %p76_p0  ;;  %p157_p7 = scmp.lt.s32.totalorder %s759_s20, 3 }
   0xb   : > { %p839_p6 = por %p150_p3, %p76_p0  ;;  %s761_s26 = smov [#allocation7]  }
   0xc   : > { %p844_p8 = pnand %p470_p5, %p157_p7  ;;  %s180_s27 = sshll.u32 %s761_s26, 4  ;;  %s181_s27 = int_to_ptr.vmem [resolvable:$true] %s180_s27 }
   0xd   : > { %s762_s29 = smov [#allocation2]   ;;  %s602_s5 = scalar_lea.vmem %s181_s27, 512 }
   0xe   : > { %p516_p9 = pneg %p844_p8  ;;  %s170_s30 = sshll.u32 %s762_s29, 4  ;;  %s171_s30 = int_to_ptr.vmem [resolvable:$true] %s170_s30 }
   0xf   : > { %p603_p13 = scmp.ne.s32.totalorder %s181_s27, %s602_s5  ;;  %p610_p5 = scmp.lt.s32.totalorder %s181_s27, %s181_s27 }
  0x10   : > { %p853_p11 = pnand %p516_p9, %p987_p1  ;;  %p611_p7 = scmp.lt.s32.totalorder %s602_s5, %s602_s5 }
  0x12   : > { %p593_p12 = pneg %p853_p11  ;;  %p612_p10 = por %p611_p7, %p610_p5 }
  0x14   : > { %p605_p0 = pnand %p603_p13, %p593_p12 }
  0x16   : > { %p606_p3 = pneg %p605_p0 }
  0x18   : > { %p613_p2 = pnand %p612_p10, %p606_p3 }
  0x1a   : > { %616 = shalt.err (!%p613_p2)
}
  0x1b   : > { %s763_s6 = smov 128   ;;  %s764_s7 = smov 8  }
  0x1c   : > { %522 = dma.hbm_to_vmem [thread:$0]  (!%p853_p11), %s984_s2, 512, %s181_s27, [#allocation6], %s763_s6, %s763_s6, %s764_s7  }
  0x1d   : > { %s628_s10 = scalar_lea.vmem %s171_s30, 32  ;;  %p636_p1 = scmp.lt.s32.totalorder %s171_s30, %s171_s30 }
  0x1e   : > { %p629_p9 = scmp.ne.s32.totalorder %s171_s30, %s628_s10  ;;  %p637_p5 = scmp.lt.s32.totalorder %s628_s10, %s628_s10 }
  0x20   : > { %p631_p13 = pnand %p629_p9, %p593_p12  ;;  %p638_p10 = por %p637_p5, %p636_p1 }
  0x22   : > { %p632_p0 = pneg %p631_p13 }
  0x24   : > { %p639_p2 = pnand %p638_p10, %p632_p0 }
  0x26   : > { %642 = shalt.err (!%p639_p2)
}
  0x27   : > { %519 = dma.hbm_to_vmem [thread:$0]  (!%p853_p11), %s982_s0, 32, %s171_s30, [#allocation3]  }
  0x28   : > { %s33_s13 = sadd.s32 1, %s755_s19  ;;  %s63_s14 = sadd.s32 1, %s747_s17 }
  0x29   : > { %p35_p1 = scmp.ge.s32.totalorder %s33_s13, 2  ;;  %p70_p12 = scmp.ne.s32.totalorder %s747_s17, %s743_s16 }
  0x2a   : > { %p71_p3 = scmp.eq.s32.totalorder %s759_s20, 0  ;;  %p533_p7 = scmp.lt.s32.totalorder %s759_s20, 2 }
  0x2b   : > { %s1006_s13 = smov (%p35_p1, %s33_s13), 0  ;;  %p992_p13 = scmp.eq.s32.totalorder %s825_s21, 1 }
  0x2c   : > { %p72_p9 = por %p71_p3, %p70_p12  ;;  %s58_s26 = ssub.s32 %s755_s19, %s1006_s13 }
  0x2d   : > { %p885_p0 = por %p992_p13, %p70_p12  ;;  %s197_s27 = sand.u32 1, %s759_s20  }
  0x2e   : > { %p61_p5 = scmp.eq.s32.totalorder %s58_s26, 0  ;;  %s199_s28 = sand.u32 1, %s747_s17  }
  0x2f   : > { %s475_s29 = sshll.u32 %s755_s19, 7  ;;  %s474_s5 = sshll.u32 %s199_s28, 3 }
  0x30   : > { %s895_s30 = scalar_select %p61_p5, %s747_s17, %s63_s14  }
  0x31   : > { %s207_s8 = scalar_lea.hbm %s983_s1, %s475_s29  ;;  %p900_p11 = pnand %p533_p7, %p72_p9 }
  0x32   : > { %s201_s10 = scalar_lea.vmem [#allocation5], %s474_s5  ;;  %s198_s12 = scalar_lea.sflag [#allocation6], %s197_s27 }
  0x33   : > { %s209_s11 = sshll.u32 %s201_s10, 4  ;;  %p645_p10 = pneg %p900_p11  ;;  %s210_s11 = int_to_ptr.vmem [resolvable:$true] %s209_s11 }
  0x34   : > { %s656_s26 = scalar_lea.vmem %s210_s11, 128  ;;  %s765_s14 = smov [#allocation5]  }
  0x35   : > { %p657_p2 = scmp.ne.s32.totalorder %s210_s11, %s656_s26  ;;  %s661_s28 = sshll.u32 %s765_s14, 4  ;;  %s662_s28 = int_to_ptr.vmem [resolvable:$false] %s661_s28 }
  0x36   : > { %s663_s6 = scalar_lea.vmem %s662_s28, 256  ;;  %p664_p3 = scmp.lt.s32.totalorder %s210_s11, %s662_s28 }
  0x37   : > { %p659_p1 = pnand %p657_p2, %p645_p10  ;;  %p665_p7 = scmp.lt.s32.totalorder %s663_s6, %s656_s26 }
  0x39   : > { %p660_p12 = pneg %p659_p1  ;;  %p666_p9 = por %p665_p7, %p664_p3 }
  0x3b   : > { %p667_p13 = pnand %p666_p9, %p660_p12 }
  0x3d   : > { %670 = shalt.err (!%p667_p13)
}
  0x3e   : > { %526 = dma.hbm_to_vmem [thread:$0]  (!%p900_p11), %s207_s8, 128, %s210_s11, %s198_s12  }
  0x3f   : > { %218 = sbr.rel (%p844_p8) target bundleno = 293 (0x125), region = 36  ;;  %p995_p5 = scmp.eq.s32.totalorder (!%p844_p8), %s825_s21, 0 }
  0x44   : > { %722 = dma.done.wait (%p995_p5), [#allocation3], 32   ;;  %p996_p10 = pmov %p995_p5 }
  0x45   : > { %s224_s27 = sand.u32 1, %s825_s21   ;;  %s226_s29 = sand.u32 1, %s743_s16  }
  0x46   : > { %724 = vsyncadd (%p996_p10), [#allocation3], 4294967264  ;;  %s918_s5 = sshll.u32 %s226_s29, 3  ;;  %s225_s7 = scalar_lea.sflag [#allocation6], %s224_s27 }
  0x47   : > { %s228_s8 = scalar_lea.vmem [#allocation5], %s918_s5 }
  0x48   : > { %726 = dma.done.wait (%p834_p4), %s225_s7, 128  }
  0x49   : > { %728 = vsyncadd (%p834_p4), %s225_s7, 4294967168  ;;  %p997_p8 = pmov %p995_p5 }
  0x4a   : > { %p998_p11 = pmov %p995_p5 }
  0x4b   : > { %730 = dma.done.wait (%p997_p8), [#allocation6], 512  }
  0x4c   : > { %732 = vsyncadd (%p998_p11), [#allocation6], 4294966784  ;;  %v766_v0 = vmov 0.0   ;;  %vm767_vm0 = vmmov 0   ;;  %v268_v1 = vld [vmem:[#allocation7 + $0x18] sm:$0xff]  ;;  %v267_v2 = vld [vmem:[#allocation7 + $0x10] sm:$0xff]  ;;  %s269_s9 = scalar_lea.vmem %s985_s3, %s751_s18 }
  0x4d   : > { %493 = vmatprep.subr.mxu0 %v766_v0  ;;  %501 = vmatprep.mubr.msk.f32.mxu0 %vm767_vm0, %v766_v0  ;;  %s257_s25 = scalar_lea.vmem [#allocation2], %s751_s18  ;;  %v259_v4 = vld [vmem:[%s228_s8] sm:$0xff]  ;;  %v266_v5 = vld [vmem:[#allocation7 + $0x8] sm:$0xff]  ;;  %v265_v6 = vld [vmem:[#allocation7] sm:$0xff]  ;;  %vm275_vm1 = vcmask 261120   ;;  %s485_s10 = sshll.u32 %s751_s18, 7 }
  0x4e   : > { %494 = vmatpush3.msra.mxu0 %v268_v1  ;;  %v481_v3 = vld [vmem:[%s257_s25] ss:$0 sm:$0xff]  ;;  %s256_s11 = scalar_lea.vmem [#allocation8], %s918_s5  ;;  %s939_s28 = scalar_lea.hbm %s986_s4, %s485_s10 }
  0x4f   : > { %495 = vmatprep.subr.mxu0 %v766_v0  ;;  %v264_v7 = vmul.f32 %v481_v3, %v259_v4  ;;  %v482_v8 = vld [vmem:[%s269_s9] ss:$0 sm:$0xff]  ;;  %s365_s12 = sshll.u32 %s256_s11, 4  ;;  %s351_s6 = scalar_lea.sflag [#allocation4], %s226_s29  ;;  %s366_s12 = int_to_ptr.vmem [resolvable:$true] %s365_s12 }
  0x50   : > { %496 = vmatpush3.msra.mxu0 %v267_v2  ;;  %s671_s27 = scalar_lea.vmem %s366_s12, 128  ;;  %s768_s18 = smov [#allocation8]  }
  0x51   : > { %497 = vmatprep.subr.mxu0 %v766_v0  ;;  %p672_p4 = scmp.ne.s32.totalorder %s366_s12, %s671_s27  ;;  %s675_s5 = sshll.u32 %s768_s18, 4  ;;  %s676_s5 = int_to_ptr.vmem [resolvable:$false] %s675_s5 }
  0x52   : > { %498 = vmatpush3.msra.mxu0 %v266_v5  ;;  %s677_s7 = scalar_lea.vmem %s676_s5, 256  ;;  %p678_p12 = scmp.lt.s32.totalorder %s366_s12, %s676_s5 }
  0x53   : > { %499 = vmatprep.subr.mxu0 %v766_v0  ;;  %p673_p2 = pnand %p672_p4, %p885_p0  ;;  %p679_p3 = scmp.lt.s32.totalorder %s677_s7, %s671_s27 }
  0x54   : > { %500 = vmatpush3.msra.mxu0 %v265_v6 }
  0x55   : > { %502 = vmatmul.mubr.msk.f32.vlgmr.msra.gmra.mxu0 %vm275_vm1, %v264_v7  ;;  %p674_p1 = pneg %p673_p2  ;;  %p680_p7 = por %p679_p3, %p678_p12 }
  0x57   : > { %p681_p9 = pnand %p680_p7, %p674_p1 }
 0x115   : > { %v345_v9 = vpop.f32.mrf.mxu0 }
 0x116   : > { %v346_v10 = vadd.f32 %v482_v8, %v345_v9 }
 0x117   : > { %v503_v11 = vpop.f32.mrf.mxu0 }
 0x118   : > { %349 = vst [vmem:[%s256_s11] sm:$0xff] %v346_v10 }
 0x119   : > { %684 = shalt.err (!%p681_p9)
}
 0x11a   : > { %s685_s8 = scalar_lea.hbm %s939_s28, 128  ;;  %s689_s21 = scalar_lea.hbm %s986_s4, 256 }
 0x11b   : > { %p686_p13 = scmp.ne.s32.totalorder %s939_s28, %s685_s8  ;;  %p690_p8 = scmp.lt.s32.totalorder %s939_s28, %s986_s4 }
 0x11c   : > { %p691_p11 = scmp.lt.s32.totalorder %s689_s21, %s685_s8 }
 0x11d   : > { %p687_p5 = pnand %p686_p13, %p885_p0 }
 0x11e   : > { %p692_p4 = por %p691_p11, %p690_p8 }
 0x11f   : > { %p688_p10 = pneg %p687_p5 }
 0x121   : > { %p693_p2 = pnand %p692_p4, %p688_p10 }
 0x123   : > { %696 = shalt.err (!%p693_p2)
}
 0x124   : > { %514 = dma.vmem_to_hbm [thread:$0]  (%p885_p0), %s366_s12, 128, %s939_s28, %s351_s6  }
 0x125 PF: > { %s377_s10 = sand.u32 1, %s739_s15   ;;  %p999_p1 = scmp.ge.s32.totalorder %s759_s20, 2 }
 0x126   : > { %s378_s11 = scalar_lea.sflag [#allocation4], %s377_s10 }
 0x127   : > { %p528_p12 = pnand %p999_p1, %p839_p6 }
 0x129   : > { %p529_p3 = pneg %p528_p12 }
 0x12b   : > { %734 = dma.done.wait (%p529_p3), %s378_s11, 128  }
 0x12c   : > { %736 = vsyncadd (%p529_p3), %s378_s11, 4294967168  ;;  %s21_s20 = sadd.s32 1, %s759_s20   ;;  %s1000_s15 = smov %s743_s16 }
 0x12d   : > { %p18_p7 = scmp.ge.s32.totalorder %s21_s20, 4   ;;  %s1001_s16 = smov %s747_s17 }
 0x12e   : > { %s1002_s17 = smov %s895_s30  ;;  %s1003_s18 = smov %s755_s19 }
 0x12f   : > { %s1004_s19 = smov %s1006_s13  ;;  %20 = sbr.rel (!%p18_p7) target bundleno = 7 (0x7), region = 92 }
 0x134   :  { %383 = vsyncpa [#allocation3], 1 }
 0x135   :  { %385 = vsyncpa [#allocation3 + $0x1], 1 }
 0x136   :  { %386 = vsyncpa [#allocation6], 1 }
 0x137   :  { %388 = vsyncpa [#allocation6 + $0x1], 1 }
 0x138   :  { %389 = vsyncpa [#allocation4], 1 }
 0x139   :  { %391 = vsyncpa [#allocation4 + $0x1], 1 }

</bundles_post_ra>
